<compile_context>
chip_gen: v6e
topology: v6e:2x2x1
jax: 0.10.0
libtpu: 0.0.40
codegen_flags: <defaults>
</compile_context>

<pallas_src>
import functools

import jax
import jax.numpy as jnp
from jax.experimental import pallas as pl
from jax.experimental.pallas import tpu as pltpu


def _nablat_2d_kernel(x_ref, halo_ref, o_ref, *, w0=1.0, w1=1.0, stride=1):
    _, TH, W = o_ref.shape
    HALO = halo_ref.shape[2]
    t = pl.program_id(1)
    n_t = pl.num_programs(1)

    x0 = x_ref[0, 0]        # (TH, W) — adjoint-differenced along rows (sublanes)
    x1 = x_ref[0, 1]        # (TH, W) — adjoint-differenced along cols (lanes)

    # ---- axis 0: x0[i-1] - x0[i], zero above global row 0 / below global row H-1 ----
    prev = halo_ref[0, 0][HALO - 1:, :]              # (1, W): last row of previous tile
    prev = jnp.where(t == 0, 0.0, prev)              # global top boundary -> 0
    lrow = jax.lax.broadcasted_iota(jnp.int32, (TH, 1), 0)
    sh0 = pltpu.roll(x0, shift=1, axis=0)            # sh0[i] = x0[i-1]; row 0 is circular junk
    sh0 = jnp.where(lrow == 0, prev, sh0)            # patch row 0 with the halo row
    last_row = jnp.logical_and(t == n_t - 1, lrow == TH - 1)
    d0 = sh0 - jnp.where(last_row, 0.0, x0)          # drop -x0 term on global row H-1

    # ---- axis 1: x1[:,j-1] - x1[:,j]; stride==2 when real/imag are lane-interleaved ----
    col = jax.lax.broadcasted_iota(jnp.int32, (1, W), 1)
    sh1 = pltpu.roll(x1, shift=stride, axis=1)
    d1 = jnp.where(col < stride, 0.0, sh1) - jnp.where(col >= W - stride, 0.0, x1)

    acc = d0 if w0 == 1.0 else w0 * d0
    acc = acc + (d1 if w1 == 1.0 else w1 * d1)
    o_ref[0] = acc.astype(o_ref.dtype)


def _vmem_capacity_bytes():
    """Per-core VMEM capacity; conservative (v7x-safe) fallback if query fails."""
    try:
        cap = getattr(pltpu.get_tpu_info(), "vmem_capacity_bytes", None)
        if cap:
            return int(cap)
    except Exception:
        pass
    return 64 * 1024 * 1024


def _min_tile_rows(itemsize):
    # packed sublane tiling: 8 rows for 32-bit, 16 for bf16/f16, 32 for int8/fp8
    return max(8, 32 // max(int(itemsize), 1))


def _pick_tile_h(Hp, W, itemsize, min_tile, vmem_cap):
    """Largest row-tile dividing Hp whose double-buffered footprint fits the budget."""
    budget = int(0.6 * vmem_cap)          # ~38 MiB on v7x (64 MiB), ~77 MiB on v5e/v6e
    halo = min_tile
    cands = [d for d in range(min_tile, Hp + 1, min_tile) if Hp % d == 0]
    for th in sorted(cands, reverse=True):
        # 2 buffers x (2 input planes + halo + 1 output plane)
        if 2 * (3 * th + halo) * W * itemsize <= budget:
            return th
    return min_tile


def _nablat_2d(xs, *, weights=(1.0, 1.0), lane_stride=1, tile_h=None):
    """xs: (B, 2, H, W) real array -> (B, H, W).  lane_stride=2 for complex-interleaved W."""
    B, C, H, W = xs.shape
    if C != 2:
        raise ValueError(f"mode '2d' expects component axis of size 2, got {C}")
    itemsize = jnp.dtype(xs.dtype).itemsize
    min_tile = _min_tile_rows(itemsize)
    vmem_cap = _vmem_capacity_bytes()

    # ---- ragged H: pad to a multiple of the minimum sublane tile ----------------
    Hp = H
    if H % min_tile != 0:
        Hp = ((H + min_tile - 1) // min_tile) * min_tile
        # The adjoint never reads component 0's last row (its forward difference is
        # outside the image), so zeroing it keeps rows [0, H) exact after padding.
        xs = xs.at[:, 0, H - 1, :].set(0)
        xs = jnp.pad(xs, ((0, 0), (0, 0), (0, Hp - H), (0, 0)))

    TH = int(tile_h) if tile_h is not None else _pick_tile_h(Hp, W, itemsize, min_tile, vmem_cap)
    if Hp % TH != 0 or TH % min_tile != 0:
        raise ValueError(f"tile_h={TH} must divide H(padded)={Hp} and be a multiple of {min_tile}")
    HALO = min_tile
    n_t = Hp // TH

    kernel = functools.partial(_nablat_2d_kernel,
                               w0=float(weights[0]), w1=float(weights[1]),
                               stride=int(lane_stride))

    # double-buffered per-step footprint + headroom, capped below physical VMEM
    need = 2 * (3 * TH + HALO) * W * itemsize
    vmem_limit = int(min(max(need + 8 * 1024 * 1024, 32 * 1024 * 1024),
                         vmem_cap - 16 * 1024 * 1024))

    # bandwidth-bound hint for XLA's scheduler
    cost = pl.CostEstimate(
        flops=int(5 * B * Hp * W),
        transcendentals=0,
        bytes_accessed=int((3 * B * Hp * W + B * n_t * HALO * W) * itemsize),
    )

    # TODO(synk): if W is not a multiple of 128, the final lane group of each row uses
    # masked partial stores; 128-aligned W is preferred (padding W would cost an extra
    # full HBM pass, so it is intentionally not done here).
    out = pl.pallas_call(
        kernel,
        out_shape=jax.ShapeDtypeStruct((B, Hp, W), xs.dtype),
        grid=(B, n_t),
        in_specs=[
            # main block: both components, TH rows, full lane-dense W
            pl.BlockSpec((1, 2, TH, W), lambda b, t: (b, 0, t, 0)),
            # halo block: component 0 only, the min_tile rows ending at the previous
            # tile's last row (clamped at the top; value unused when t == 0)
            pl.BlockSpec((1, 1, HALO, W),
                         lambda b, t: (b, 0, jnp.maximum(t * (TH // HALO) - 1, 0), 0)),
        ],
        out_specs=pl.BlockSpec((1, TH, W), lambda b, t: (b, t, 0)),
        compiler_params=pltpu.CompilerParams(
            dimension_semantics=("parallel", "parallel"),
            vmem_limit_bytes=vmem_limit,
        ),
        cost_estimate=cost,
    )(xs, xs)

    return out[:, :H] if Hp != H else out


def _complex_to_interleaved(x):
    """(..., W) complex -> (..., 2W) float with real/imag interleaved on the lane axis."""
    real_dtype = jnp.float32 if x.dtype == jnp.complex64 else jnp.float64
    try:
        f = jax.lax.bitcast_convert_type(x, real_dtype)          # zero-copy when supported
    except Exception:
        f = jnp.stack([jnp.real(x), jnp.imag(x)], axis=-1)       # single fused pass fallback
    return f.reshape(*x.shape[:-1], 2 * x.shape[-1])


def _interleaved_to_complex(out_f, complex_dtype):
    """(H, 2W) interleaved float -> (H, W) complex."""
    H, W2 = out_f.shape
    try:
        return jax.lax.bitcast_convert_type(out_f.reshape(H, W2 // 2, 2), complex_dtype)
    except Exception:
        return jax.lax.complex(out_f[:, 0::2], out_f[:, 1::2])


def nablaT(x, mode="2d", beta=None, *, tile_h=None):
    """JAX/Pallas equivalent of medutils nablaT / NablaT.forward (2-D modes)."""
    if mode == "2d":
        weights = (1.0, 1.0)
    elif mode == "2dt":
        assert isinstance(beta, tuple) and len(beta) == 2
        mu1, mu2 = beta
        weights = (float(mu2), float(mu1))   # out = mu2 * d0 + mu1 * d1
    else:
        # TODO(synk): '1d'/'3d'/'4d' (and '1dt'/'3dt') need 1-D/3-D spatial stencil variants.
        raise NotImplementedError(f"Pallas NablaT implements '2d'/'2dt' only, got {mode!r}")

    x = jnp.asarray(x)
    if x.ndim != 3 or x.shape[0] != 2:
        raise ValueError(f"mode '2d' expects x of shape (2, H, W), got {x.shape}")

    if jnp.iscomplexobj(x):
        # single fused launch on a lane-interleaved real view — no per-plane batch axis
        xf = _complex_to_interleaved(x)                                # (2, H, 2W) float
        out = _nablat_2d(xf[jnp.newaxis], weights=weights, lane_stride=2, tile_h=tile_h)[0]
        return _interleaved_to_complex(out, x.dtype)                   # (H, W) complex
    out = _nablat_2d(x[jnp.newaxis], weights=weights, lane_stride=1, tile_h=tile_h)
    return out[0]


class NablaT:
    """Callable mirroring the PyTorch NablaT module."""

    def __init__(self, mode="2d", beta=None):
        self.mode = mode
        self.beta = beta

    def __call__(self, x, tile_h=None):
        return nablaT(x, mode=self.mode, beta=self.beta, tile_h=tile_h)


def _nablat_2d_ref(x, w0=1.0, w1=1.0):
    """Pure-JAX reference mirroring the PyTorch pad/slice arithmetic."""
    x0, x1 = x[0], x[1]
    d0 = jnp.pad(x0[:-1, :], ((1, 0), (0, 0))) - jnp.pad(x0[:-1, :], ((0, 1), (0, 0)))
    d1 = jnp.pad(x1[:, :-1], ((0, 0), (1, 0))) - jnp.pad(x1[:, :-1], ((0, 0), (0, 1)))
    return w0 * d0 + w1 * d1


if __name__ == "__main__":
    key = jax.random.PRNGKey(0)
    k1, k2, k3, k4 = jax.random.split(key, 4)

    # 1) small real input, single tile
    x_small = jax.random.normal(k1, (2, 16, 16), dtype=jnp.float32)
    out = jax.block_until_ready(nablaT(x_small, mode="2d"))
    ref = _nablat_2d_ref(x_small)
    assert out.shape == (16, 16) and out.dtype == jnp.float32
    assert jnp.allclose(out, ref, atol=1e-5, rtol=1e-5), "2d single-tile mismatch"

    # 2) real input, forced multi-tile grid (exercises the row-halo path)
    x_med = jax.random.normal(k2, (2, 128, 128), dtype=jnp.float32)
    out2 = jax.block_until_ready(nablaT(x_med, mode="2d", tile_h=32))
    ref2 = _nablat_2d_ref(x_med)
    assert jnp.allclose(out2, ref2, atol=1e-5, rtol=1e-5), "2d multi-tile mismatch"

    # 3) complex input, in-kernel lane-interleaved path, multi-tile
    xr = jax.random.normal(k3, (2, 2, 64, 128), dtype=jnp.float32)
    xc = jax.lax.complex(xr[0], xr[1])                    # (2, 64, 128) complex64
    out3 = jax.block_until_ready(nablaT(xc, mode="2d", tile_h=16))
    ref3 = jax.lax.complex(_nablat_2d_ref(xr[0]), _nablat_2d_ref(xr[1]))
    assert out3.dtype == jnp.complex64
    assert jnp.allclose(out3, ref3, atol=1e-5, rtol=1e-5), "2d complex mismatch"

    # 4) weighted '2dt' mode: out = mu2 * d0 + mu1 * d1 with beta = (mu1, mu2)
    out4 = jax.block_until_ready(nablaT(x_small, mode="2dt", beta=(0.7, 1.3)))
    ref4 = _nablat_2d_ref(x_small, w0=1.3, w1=0.7)
    assert jnp.allclose(out4, ref4, atol=1e-5, rtol=1e-5), "2dt mismatch"

    # 5) ragged H (not a multiple of 8): exercises wrapper-side padding path
    x_rag = jax.random.normal(k4, (2, 20, 128), dtype=jnp.float32)
    out5 = jax.block_until_ready(nablaT(x_rag, mode="2d"))
    ref5 = _nablat_2d_ref(x_rag)
    assert out5.shape == (20, 128)
    assert jnp.allclose(out5, ref5, atol=1e-5, rtol=1e-5), "2d ragged-H mismatch"

    print("KERNEL_OK")
</pallas_src>

<mosaic_0001>
module attributes {stable_mosaic.version = 11 : i64} {
  func.func @_nablat_2d_kernel(%arg0: i32, %arg1: i32, %arg2: memref<1x2x16x16xf32, #tpu.memory_space<vmem>>, %arg3: memref<1x1x8x16xf32, #tpu.memory_space<vmem>>, %arg4: memref<1x16x16xf32, #tpu.memory_space<vmem>>) attributes {dimension_semantics = [#tpu.dimension_semantics<parallel>, #tpu.dimension_semantics<parallel>], iteration_bounds = array<i64: 1, 1>, scalar_prefetch = 0 : i64, scratch_operands = 0 : i64, tpu.core_type = #tpu.core_type<tc>, window_params = [{transform_indices = @transform_0, window_bounds = array<i64: 1, 2, 16, 16>}, {transform_indices = @transform_1, window_bounds = array<i64: 1, 1, 8, 16>}, {transform_indices = @transform_2, window_bounds = array<i64: 1, 16, 16>}]} {
    %c0 = arith.constant 0 : index
    %c0_0 = arith.constant 0 : index
    %c0_1 = arith.constant 0 : index
    %c0_2 = arith.constant 0 : index
    %0 = vector.load %arg2[%c0, %c0_0, %c0_1, %c0_2] : memref<1x2x16x16xf32, #tpu.memory_space<vmem>>, vector<1x1x16x16xf32>
    %1 = vector.shape_cast %0 : vector<1x1x16x16xf32> to vector<16x16xf32>
    %c0_3 = arith.constant 0 : index
    %c1 = arith.constant 1 : index
    %c0_4 = arith.constant 0 : index
    %c0_5 = arith.constant 0 : index
    %2 = vector.load %arg2[%c0_3, %c1, %c0_4, %c0_5] : memref<1x2x16x16xf32, #tpu.memory_space<vmem>>, vector<1x1x16x16xf32>
    %3 = vector.shape_cast %2 : vector<1x1x16x16xf32> to vector<16x16xf32>
    %c0_6 = arith.constant 0 : index
    %c0_7 = arith.constant 0 : index
    %c0_8 = arith.constant 0 : index
    %c0_9 = arith.constant 0 : index
    %4 = vector.load %arg3[%c0_6, %c0_7, %c0_8, %c0_9] : memref<1x1x8x16xf32, #tpu.memory_space<vmem>>, vector<1x1x8x16xf32>
    %5 = vector.shape_cast %4 : vector<1x1x8x16xf32> to vector<8x16xf32>
    %6 = vector.extract_strided_slice %5 {offsets = [7, 0], sizes = [1, 16], strides = [1, 1]} : vector<8x16xf32> to vector<1x16xf32>
    %c0_i32 = arith.constant 0 : i32
    %7 = arith.cmpi eq, %arg1, %c0_i32 : i32
    %cst = arith.constant 0.000000e+00 : f32
    %8 = vector.broadcast %cst : f32 to vector<1x16xf32>
    %9 = arith.select %7, %8, %6 : vector<1x16xf32>
    %10 = tpu.iota {dimensions = array<i32: 0>} : vector<16x1xi32>
    %c1_i32 = arith.constant 1 : i32
    %11 = tpu.dynamic_rotate %1 by %c1_i32 dim 0 : vector<16x16xf32>, i32 -> vector<16x16xf32>
    %c0_i32_10 = arith.constant 0 : i32
    %12 = vector.broadcast %c0_i32_10 : i32 to vector<16x1xi32>
    %13 = arith.cmpi eq, %10, %12 : vector<16x1xi32>
    %14 = vector.shape_cast %13 : vector<16x1xi1> to vector<16x1xi1>
    %15 = vector.broadcast %14 : vector<16x1xi1> to vector<16x16xi1>
    %16 = vector.shape_cast %9 : vector<1x16xf32> to vector<1x16xf32>
    %17 = vector.broadcast %16 : vector<1x16xf32> to vector<16x16xf32>
    %18 = arith.select %15, %17, %11 : vector<16x16xi1>, vector<16x16xf32>
    %c0_i32_11 = arith.constant 0 : i32
    %19 = arith.cmpi eq, %arg1, %c0_i32_11 : i32
    %c15_i32 = arith.constant 15 : i32
    %20 = vector.broadcast %c15_i32 : i32 to vector<16x1xi32>
    %21 = arith.cmpi eq, %10, %20 : vector<16x1xi32>
    %22 = vector.broadcast %19 : i1 to vector<16x1xi1>
    %23 = arith.andi %22, %21 : vector<16x1xi1>
    %cst_12 = arith.constant 0.000000e+00 : f32
    %24 = vector.shape_cast %23 : vector<16x1xi1> to vector<16x1xi1>
    %25 = vector.broadcast %24 : vector<16x1xi1> to vector<16x16xi1>
    %26 = vector.broadcast %cst_12 : f32 to vector<16x16xf32>
    %27 = arith.select %25, %26, %1 : vector<16x16xi1>, vector<16x16xf32>
    %28 = arith.subf %18, %27 : vector<16x16xf32>
    %29 = tpu.iota {dimensions = array<i32: 1>} : vector<1x16xi32>
    %c1_i32_13 = arith.constant 1 : i32
    %30 = tpu.dynamic_rotate %3 by %c1_i32_13 dim 1 : vector<16x16xf32>, i32 -> vector<16x16xf32>
    %c1_i32_14 = arith.constant 1 : i32
    %31 = vector.broadcast %c1_i32_14 : i32 to vector<1x16xi32>
    %32 = arith.cmpi slt, %29, %31 : vector<1x16xi32>
    %cst_15 = arith.constant 0.000000e+00 : f32
    %33 = vector.shape_cast %32 : vector<1x16xi1> to vector<1x16xi1>
    %34 = vector.broadcast %33 : vector<1x16xi1> to vector<16x16xi1>
    %35 = vector.broadcast %cst_15 : f32 to vector<16x16xf32>
    %36 = arith.select %34, %35, %30 : vector<16x16xi1>, vector<16x16xf32>
    %c15_i32_16 = arith.constant 15 : i32
    %37 = vector.broadcast %c15_i32_16 : i32 to vector<1x16xi32>
    %38 = arith.cmpi sge, %29, %37 : vector<1x16xi32>
    %cst_17 = arith.constant 0.000000e+00 : f32
    %39 = vector.shape_cast %38 : vector<1x16xi1> to vector<1x16xi1>
    %40 = vector.broadcast %39 : vector<1x16xi1> to vector<16x16xi1>
    %41 = vector.broadcast %cst_17 : f32 to vector<16x16xf32>
    %42 = arith.select %40, %41, %3 : vector<16x16xi1>, vector<16x16xf32>
    %43 = arith.subf %36, %42 : vector<16x16xf32>
    %44 = arith.addf %28, %43 : vector<16x16xf32>
    %c0_18 = arith.constant 0 : index
    %c0_19 = arith.constant 0 : index
    %c0_20 = arith.constant 0 : index
    %45 = vector.load %arg4[%c0_18, %c0_19, %c0_20] : memref<1x16x16xf32, #tpu.memory_space<vmem>>, vector<1x16x16xf32>
    %46 = vector.shape_cast %45 : vector<1x16x16xf32> to vector<16x16xf32>
    %47 = vector.shape_cast %44 : vector<16x16xf32> to vector<1x16x16xf32>
    tpu.vector_store %arg4[%c0_18, %c0_19, %c0_20], %47 {strides = array<i32>} : memref<1x16x16xf32, #tpu.memory_space<vmem>>, vector<1x16x16xf32>,
    return
  }
  func.func @transform_0(%arg0: i32, %arg1: i32) -> (i32, i32, i32, i32) {
    %c0_i32 = arith.constant 0 : i32
    %c0_i32_0 = arith.constant 0 : i32
    %c0_i32_1 = arith.constant 0 : i32
    return %arg0, %c0_i32, %arg1, %c0_i32_0 : i32, i32, i32, i32
  }
  func.func @transform_1(%arg0: i32, %arg1: i32) -> (i32, i32, i32, i32) {
    %c2_i32 = arith.constant 2 : i32
    %0 = arith.muli %arg1, %c2_i32 : i32
    %c1_i32 = arith.constant 1 : i32
    %1 = arith.subi %0, %c1_i32 : i32
    %c0_i32 = arith.constant 0 : i32
    %2 = arith.maxsi %1, %c0_i32 : i32
    %c0_i32_0 = arith.constant 0 : i32
    %c0_i32_1 = arith.constant 0 : i32
    %c0_i32_2 = arith.constant 0 : i32
    return %arg0, %c0_i32_0, %2, %c0_i32_1 : i32, i32, i32, i32
  }
  func.func @transform_2(%arg0: i32, %arg1: i32) -> (i32, i32, i32) {
    %c0_i32 = arith.constant 0 : i32
    %c0_i32_0 = arith.constant 0 : i32
    return %arg0, %arg1, %c0_i32 : i32, i32, i32
  }
}

</mosaic_0001>

<bundles_post_ra>
// kernel: tpu_custom_call.1
= control target key start
LH: loop header
LB: loop body
LE: loop exit
PB: predicated region body
PF: predicated region fallthrough
CT: control target
= control target key end

     0   :  { %7 = vsyncpa [#allocation3], 0  ;;  %s263_s0 = inlined_call_operand.hbm [shape: f32[1,2,16,16], index: 0, kind: input, shape index: {}]   ;;  %s264_s1 = inlined_call_operand.hbm [shape: f32[1,2,16,16], index: 1, kind: input, shape index: {}]   ;;  %s265_s2 = inlined_call_operand.hbm [shape: f32[1,16,16], index: 2, kind: output, shape index: {}]  }
   0x1   :  { %8 = vsyncpa [#allocation6], 0 }
   0x2   :  { %9 = vsyncpa [#allocation4], 0  ;;  %s225_s9 = smov [#allocation2]  }
   0x3   :  { %s15_s10 = sshll.u32 %s225_s9, 4  ;;  %s16_s10 = int_to_ptr.vmem [resolvable:$true] %s15_s10 }
   0x4   :  { %s167_s11 = scalar_lea.vmem %s16_s10, 512  ;;  %p172_p1 = scmp.lt.s32.totalorder %s16_s10, %s16_s10 }
   0x5   :  { %p168_p0 = scmp.ne.s32.totalorder %s16_s10, %s167_s11  ;;  %p173_p2 = scmp.lt.s32.totalorder %s167_s11, %s167_s11 }
   0x7   :  { %p174_p3 = por %p173_p2, %p172_p1 }
   0x9   :  { %p175_p4 = pnand %p174_p3, %p168_p0 }
   0xb   :  { %178 = shalt.err (!%p175_p4)
}
   0xc   :  { %s226_s12 = smov 128   ;;  %s227_s13 = smov 8  }
   0xd   :  { %21 = dma.hbm_to_vmem [thread:$0]  %s263_s0, 512, %s16_s10, [#allocation3], %s226_s12, %s226_s12, %s227_s13  }
   0xe   :  { %s228_s16 = smov [#allocation5]  }
   0xf   :  { %s34_s17 = sshll.u32 %s228_s16, 4  ;;  %s35_s17 = int_to_ptr.vmem [resolvable:$true] %s34_s17 }
  0x10   :  { %s187_s18 = scalar_lea.vmem %s35_s17, 128  ;;  %p192_p6 = scmp.lt.s32.totalorder %s35_s17, %s35_s17 }
  0x11   :  { %p188_p5 = scmp.ne.s32.totalorder %s35_s17, %s187_s18  ;;  %p193_p7 = scmp.lt.s32.totalorder %s187_s18, %s187_s18 }
  0x13   :  { %p194_p8 = por %p193_p7, %p192_p6 }
  0x15   :  { %p195_p9 = pnand %p194_p8, %p188_p5 }
  0x17   :  { %198 = shalt.err (!%p195_p9)
}
  0x18   :  { %37 = dma.hbm_to_vmem [thread:$0]  %s264_s1, 128, %s35_s17, [#allocation6]  }
  0x19   :  { %219 = dma.done.wait [#allocation3], 512  }
  0x1a   :  { %220 = vsyncadd [#allocation3], 4294966784 }
  0x1b   :  { %221 = dma.done.wait [#allocation6], 128  }
  0x1c   :  { %222 = vsyncadd [#allocation6], 4294967168  ;;  %v51_v0 = vld [vmem:[#allocation2 + $0x10] sm:$0xff]  ;;  %s229_s0 = smov 16   ;;  %v52_v1 = vld [vmem:[#allocation2 + $0x18] sm:$0xff]  ;;  %vm93_vm0 = vcmask 1047680   ;;  %v59_v10 = vlaneseq }
  0x1d   :  { %94 = vrot.lane.b32.xlu0 %v51_v0, %s229_s0  ;;  %s230_s21 = smov 113   ;;  %v48_v12 = vld [vmem:[#allocation2] sm:$0xff]  ;;  %v49_v13 = vld [vmem:[#allocation2 + $0x8] sm:$0xff]  ;;  %v231_v18 = vmov 0.0   ;;  %vm128_vm6 = vcmask 130048   ;;  %s232_s1 = smov [#allocation7]  }
  0x1e   :  { %v60_v11 = vshrl.u32 %v59_v10, 7  ;;  %v62_v15 = vrot.slane %v48_v12, 7  ;;  %v63_v16 = vrot.slane %v49_v13, 7  ;;  %v92_v17 = vand.u32 127, %v59_v10  ;;  %s136_s22 = sshll.u32 %s232_s1, 4  ;;  %s137_s22 = int_to_ptr.vmem [resolvable:$true] %s136_s22 }
  0x1f   :  { %s199_s23 = scalar_lea.vmem %s137_s22, 256  ;;  %p204_p11 = scmp.lt.s32.totalorder %s137_s22, %s137_s22 }
  0x20   :  { %v75_v14 = vsub.s32 7, %v60_v11  ;;  %vm64_vm1 = vcmp.lt.s32.totalorder %v60_v11, 1  ;;  %vm67_vm2 = vcmp.eq.s32.totalorder %v60_v11, 0  ;;  %v61_v21 = vadd.s32 8, %v60_v11  ;;  %p200_p10 = scmp.ne.s32.totalorder %s137_s22, %s199_s23  ;;  %p205_p12 = scmp.lt.s32.totalorder %s199_s23, %s199_s23 }
  0x21   :  { %97 = vrot.lane.b32.xlu0 %v52_v1, %s229_s0  ;;  %v66_v20 = vsel %vm64_vm1, %v63_v16, %v62_v15  ;;  %vm119_vm3 = vcmp.ge.s32.totalorder %v92_v17, 15  ;;  %vm106_vm4 = vcmp.lt.s32.totalorder %v92_v17, 1  ;;  %v65_v27 = vsel %vm64_vm1, %v62_v15, %v63_v16 }
  0x22   :  { %v76_v19 = vrot.slane %v231_v18, %v75_v14  ;;  %vm80_vm5 = vcmp.eq.s32.totalorder %v61_v21, 15  ;;  %v122_v23 = vsel %vm119_vm3, 0.0, %v51_v0  ;;  %v123_v30 = vsel %vm119_vm3, 0.0, %v52_v1  ;;  %p206_p13 = por %p205_p12, %p204_p11 }
  0x23   :  { %v88_v28 = vsel %vm80_vm5, 0.0, %v49_v13 }
  0x24   :  { %v77_v22 = vsel %vm67_vm2, %v76_v19, %v66_v20  ;;  %v90_v33 = vsub.f32 %v65_v27, %v88_v28  ;;  %p207_p0 = pnand %p206_p13, %p200_p10 }
  0x25   :  { %v89_v25 = vsub.f32 %v77_v22, %v48_v12 }
  0x8f   :  { %v95_v2 = vpop.permute.xlu0 %94 }
  0x90   :  { %v96_v3 = vsel %vm93_vm0, %v95_v2, %v51_v0 }
  0x91   :  { %100 = vrot.lane.b32.xlu1 %v96_v3, %s229_s0 }
  0x93   :  { %v98_v4 = vpop.permute.xlu0 %97 }
  0x94   :  { %v99_v5 = vsel %vm93_vm0, %v98_v4, %v52_v1 }
  0x95   :  { %102 = vrot.lane.b32.xlu1 %v99_v5, %s229_s0 }
 0x103   :  { %v101_v6 = vpop.permute.xlu1 %100 }
 0x104   :  { %v104_v7 = vsel %vm93_vm0, %v101_v6, %v51_v0 }
 0x105   :  { %111 = vrot.lane.b32.xlu0 %v104_v7, %s230_s21 }
 0x107   :  { %v103_v8 = vpop.permute.xlu1 %102 }
 0x108   :  { %v105_v9 = vsel %vm93_vm0, %v103_v8, %v52_v1 }
 0x109   :  { %113 = vrot.lane.b32.xlu1 %v105_v9, %s230_s21 }
 0x177   :  { %v112_v24 = vpop.permute.xlu0 %111 }
 0x178   :  { %v117_v26 = vsel %vm106_vm4, 0.0, %v112_v24 }
 0x179   :  { %v124_v29 = vsub.f32 %v117_v26, %v122_v23 }
 0x17b   :  { %v126_v31 = vadd.f32 %v124_v29, %v89_v25  ;;  %v114_v32 = vpop.permute.xlu1 %113 }
 0x17c   :  { %v118_v34 = vsel %vm106_vm4, 0.0, %v114_v32 }
 0x17d   :  { %v125_v35 = vsub.f32 %v118_v34, %v123_v30  ;;  %129 = vst.msk [vmem:[#allocation7] sm:$0xff] %vm128_vm6, %v126_v31 }
 0x17f   :  { %v127_v36 = vadd.f32 %v125_v35, %v90_v33 }
 0x181   :  { %130 = vst.msk [vmem:[#allocation7 + $0x8] sm:$0xff] %vm128_vm6, %v127_v36 }
 0x182   :  { %210 = shalt.err (!%p207_p0)
}
 0x183   :  { %142 = dma.vmem_to_hbm [thread:$0]  %s137_s22, 256, %s265_s2, [#allocation4], %s226_s12, %s226_s12, %s227_s13  }
 0x184   :  { %223 = dma.done.wait [#allocation4], 256  }
 0x185   :  { %224 = vsyncadd [#allocation4], 4294967040 }
 0x186   :  { %146 = vsyncpa [#allocation3], 1 }
 0x187   :  { %147 = vsyncpa [#allocation6], 1 }
 0x188   :  { %148 = vsyncpa [#allocation4], 1 }

</bundles_post_ra>
